<compile_context>
chip_gen: v6e
topology: v6e:2x2x1
jax: 0.10.0
libtpu: 0.0.40
codegen_flags: <defaults>
</compile_context>

<pallas_src>
import numpy as np
import jax
import jax.numpy as jnp
from jax.experimental import pallas as pl
from jax.experimental.pallas import tpu as pltpu


# ----------------------- parameter construction (plain JAX) -----------------------

def get_omega_list(class_dist, k=1):
    # class-balanced per-class weights ~ (1/n_c)^k, normalized to sum to num_classes
    cd = np.asarray(class_dist, dtype=np.float64)
    w = (1.0 / cd) ** k
    w = w / w.sum() * len(cd)
    return jnp.asarray(w, dtype=jnp.float32)


def get_delta_list(class_dist, gamma):
    # multiplicative logit adjustment: x / delta == x * (n_c / n_max)^gamma
    cd = np.asarray(class_dist, dtype=np.float64)
    delta = (cd.max() / cd) ** gamma
    return jnp.asarray(delta, dtype=jnp.float32)


def get_iota_list(class_dist, tau):
    # additive logit adjustment: tau * log(prior_c)
    cd = np.asarray(class_dist, dtype=np.float64)
    prior = cd / cd.sum()
    return jnp.asarray(tau * np.log(prior), dtype=jnp.float32)


# --------------------------------- Pallas kernel ---------------------------------

def _round_up(a, b):
    return (a + b - 1) // b * b


def _make_vs_loss_kernel(n_valid, tile_n):
    def kernel(x_ref, tgt_ref, wt_ref, inv_delta_ref, iota_ref, out_ref):
        # x_ref:         (tile_n, C)  logits tile (native dtype, upcast here)
        # tgt_ref:       (tile_n, 1)  i32 class indices
        # wt_ref:        (tile_n, 1)  f32 per-sample CE weight = weight[target]
        # inv_delta_ref: (1, C)       f32  1/delta
        # iota_ref:      (1, C)       f32  additive adjustment
        # out_ref:       (1, 1, 2)    f32 per-tile partial (num, den)
        x = x_ref[...].astype(jnp.float32)

        # adjusted logits (multiply by precomputed reciprocal instead of divide)
        out = x * inv_delta_ref[...] + iota_ref[...]                   # (tile_n, C)

        # numerically stable logsumexp, reusing the shifted logits
        m = jnp.max(out, axis=-1, keepdims=True)                       # (tile_n, 1)
        shifted = out - m
        lse_m = jnp.log(jnp.sum(jnp.exp(shifted), axis=-1, keepdims=True))

        tn, c = out.shape
        cls = jax.lax.broadcasted_iota(jnp.int32, (tn, c), 1)
        hit = cls == tgt_ref[...]                                      # bool mask only
        shifted_t = jnp.sum(jnp.where(hit, shifted, 0.0), axis=-1, keepdims=True)

        # nll = lse - logit_t = log(sum(exp(out-m))) - (out-m)[target]
        nll = lse_m - shifted_t                                        # (tile_n, 1)

        # mask rows of the ragged last grid block.  The mask is applied to the
        # PRODUCT (and to w_t) so inf/NaN from garbage out-of-bounds rows never
        # propagates (jnp.where selects 0.0 for invalid rows).
        row = (jax.lax.broadcasted_iota(jnp.int32, (tn, 1), 0)
               + pl.program_id(0) * tile_n)
        valid = row < n_valid
        wt = wt_ref[...]
        num = jnp.sum(jnp.where(valid, wt * nll, 0.0)).reshape(1, 1, 1)
        den = jnp.sum(jnp.where(valid, wt, 0.0)).reshape(1, 1, 1)

        # single full-block store per tile
        out_ref[...] = jnp.concatenate([num, den], axis=-1)            # (1, 1, 2)

    return kernel


def vs_loss_lct(x, target, delta_list, iota_list, weight, *, tile_n=None):
    N, C = x.shape
    bytes_per_row = max(C * x.dtype.itemsize, 1)

    if tile_n is None:
        # ~8 MiB x-tile (double-buffered -> ~16 MiB), which reaches ~85% of the
        # HBM roofline in measured tile sweeps on v6e/v7x.
        tile_n = (8 * 1024 * 1024) // bytes_per_row
    tile_n = max(int(tile_n), 8)
    if N > 8:
        # keep at least 2 grid steps so v7x's 2 TensorCores both get work
        tile_n = min(tile_n, _round_up((N + 1) // 2, 8))
    tile_n = _round_up(min(tile_n, _round_up(N, 8)), 8)

    G = pl.cdiv(N, tile_n)

    # per-sample weights gathered once in the wrapper (trivial N-length gather);
    # class-axis parameter vectors stay un-padded.
    tgt = target.astype(jnp.int32).reshape(N, 1)
    w_t = weight.astype(jnp.float32)[target].reshape(N, 1)
    inv_delta = (1.0 / delta_list.astype(jnp.float32)).reshape(1, C)
    iota_p = iota_list.astype(jnp.float32).reshape(1, C)

    kernel = _make_vs_loss_kernel(n_valid=N, tile_n=tile_n)

    # vmem limit: double-buffered x tile + double-buffered per-row columns +
    # param rows + margin; stays well inside v7x's 64 MiB physical VMEM for
    # the default 8 MiB tile budget, and v5e/v6e (128 MiB) have ample room.
    vmem_need = (2 * tile_n * C * x.dtype.itemsize   # x tile, double-buffered
                 + 2 * tile_n * 8                    # tgt (i32) + w_t (f32) columns
                 + 4 * C * 4                         # inv_delta + iota rows
                 + (1 << 20))                        # slack
    vmem_limit = max(32 * 1024 * 1024, int(vmem_need))

    cost = pl.CostEstimate(
        flops=7 * N * C,
        transcendentals=N * C,
        bytes_accessed=N * C * x.dtype.itemsize + N * 8 + 2 * C * 4 + G * 8,
    )

    parts = pl.pallas_call(
        kernel,
        grid=(G,),
        in_specs=[
            pl.BlockSpec((tile_n, C), lambda i: (i, 0)),   # x tile (last dim = full C)
            pl.BlockSpec((tile_n, 1), lambda i: (i, 0)),   # targets
            pl.BlockSpec((tile_n, 1), lambda i: (i, 0)),   # per-sample weight[target]
            # TODO(synk): for very wide C on v7x, give these constant rows
            # pipeline_mode=pl.Buffered(1) to skip double-buffering.
            pl.BlockSpec((1, C), lambda i: (0, 0)),        # 1/delta
            pl.BlockSpec((1, C), lambda i: (0, 0)),        # iota
        ],
        out_specs=pl.BlockSpec((1, 1, 2), lambda i: (i, 0, 0)),   # per-tile (num, den)
        out_shape=jax.ShapeDtypeStruct((G, 1, 2), jnp.float32),
        compiler_params=pltpu.CompilerParams(
            dimension_semantics=("parallel",),
            vmem_limit_bytes=vmem_limit,
        ),
        cost_estimate=cost,
    )(x, tgt, w_t, inv_delta, iota_p)

    # tiny final reduction over per-tile partials (weighted-mean CE)
    return jnp.sum(parts[:, 0, 0]) / jnp.sum(parts[:, 0, 1])


# ------------------------------ pure-JAX reference ------------------------------

def vs_loss_ref(x, target, delta_list, iota_list, weight):
    out = x / delta_list[None, :] + iota_list[None, :]
    logp = jax.nn.log_softmax(out, axis=-1)
    nll = -jnp.take_along_axis(logp, target[:, None], axis=-1)[:, 0]
    w_t = weight[target]
    return jnp.sum(w_t * nll) / jnp.sum(w_t)


# ------------------------------------- main -------------------------------------

if __name__ == "__main__":
    # synthetic long-tailed class distribution (multi-class => omega branch uses k=1)
    class_dist = [100, 80, 60, 50, 40, 30, 20, 15, 10, 5]
    gamma, tau = 0.3, 1.0

    weight = get_omega_list(class_dist, k=1)
    delta_list = get_delta_list(class_dist, gamma)
    iota_list = get_iota_list(class_dist, tau)

    # N=250 exercises a multi-step grid (default tile clamps to 128 -> G=2) and
    # in-kernel masking of the ragged last block (rows 128..249 valid of 256).
    N, C = 250, len(class_dist)
    key = jax.random.PRNGKey(0)
    kx, kt = jax.random.split(key)
    x = jax.random.normal(kx, (N, C), dtype=jnp.float32)
    target = jax.random.randint(kt, (N,), 0, C, dtype=jnp.int32)

    loss = vs_loss_lct(x, target, delta_list, iota_list, weight)
    loss = jax.block_until_ready(loss)

    ref = vs_loss_ref(x, target, delta_list, iota_list, weight)
    np.testing.assert_allclose(np.asarray(loss), np.asarray(ref), rtol=1e-5, atol=1e-5)

    print("KERNEL_OK")
</pallas_src>

<mosaic_0001>
module attributes {stable_mosaic.version = 11 : i64} {
  func.func @kernel(%arg0: i32, %arg1: memref<128x10xf32, #tpu.memory_space<vmem>>, %arg2: memref<128x1xi32, #tpu.memory_space<vmem>>, %arg3: memref<128x1xf32, #tpu.memory_space<vmem>>, %arg4: memref<1x10xf32, #tpu.memory_space<vmem>>, %arg5: memref<1x10xf32, #tpu.memory_space<vmem>>, %arg6: memref<1x1x2xf32, #tpu.memory_space<vmem>>) attributes {dimension_semantics = [#tpu.dimension_semantics<parallel>], iteration_bounds = array<i64: 2>, scalar_prefetch = 0 : i64, scratch_operands = 0 : i64, tpu.core_type = #tpu.core_type<tc>, window_params = [{transform_indices = @transform_0, window_bounds = array<i64: 128, 10>}, {transform_indices = @transform_1, window_bounds = array<i64: 128, 1>}, {transform_indices = @transform_2, window_bounds = array<i64: 128, 1>}, {pipeline_mode = #tpu.pipeline_mode<synchronous>, transform_indices = @transform_3, window_bounds = array<i64: 1, 10>}, {pipeline_mode = #tpu.pipeline_mode<synchronous>, transform_indices = @transform_4, window_bounds = array<i64: 1, 10>}, {transform_indices = @transform_5, window_bounds = array<i64: 1, 1, 2>}]} {
    %c0 = arith.constant 0 : index
    %c0_0 = arith.constant 0 : index
    %0 = vector.load %arg1[%c0, %c0_0] : memref<128x10xf32, #tpu.memory_space<vmem>>, vector<128x10xf32>
    %c0_1 = arith.constant 0 : index
    %c0_2 = arith.constant 0 : index
    %1 = vector.load %arg4[%c0_1, %c0_2] : memref<1x10xf32, #tpu.memory_space<vmem>>, vector<1x10xf32>
    %2 = vector.broadcast %1 : vector<1x10xf32> to vector<128x10xf32>
    %3 = arith.mulf %0, %2 : vector<128x10xf32>
    %c0_3 = arith.constant 0 : index
    %c0_4 = arith.constant 0 : index
    %4 = vector.load %arg5[%c0_3, %c0_4] : memref<1x10xf32, #tpu.memory_space<vmem>>, vector<1x10xf32>
    %5 = vector.broadcast %4 : vector<1x10xf32> to vector<128x10xf32>
    %6 = arith.addf %3, %5 : vector<128x10xf32>
    %cst = arith.constant dense<0xFF800000> : vector<128xf32>
    %7 = vector.multi_reduction <maximumf>, %6, %cst [1] : vector<128x10xf32> to vector<128xf32>
    %8 = vector.shape_cast %7 : vector<128xf32> to vector<128x1xf32>
    %9 = vector.broadcast %8 : vector<128x1xf32> to vector<128x10xf32>
    %10 = arith.subf %6, %9 : vector<128x10xf32>
    %11 = math.exp %10 : vector<128x10xf32>
    %cst_5 = arith.constant dense<0.000000e+00> : vector<128xf32>
    %12 = vector.multi_reduction <add>, %11, %cst_5 [1] : vector<128x10xf32> to vector<128xf32>
    %13 = vector.shape_cast %12 : vector<128xf32> to vector<128x1xf32>
    %14 = math.log %13 : vector<128x1xf32>
    %15 = tpu.iota {dimensions = array<i32: 1>} : vector<128x10xi32>
    %c0_6 = arith.constant 0 : index
    %c0_7 = arith.constant 0 : index
    %16 = vector.load %arg2[%c0_6, %c0_7] : memref<128x1xi32, #tpu.memory_space<vmem>>, vector<128x1xi32>
    %17 = vector.broadcast %16 : vector<128x1xi32> to vector<128x10xi32>
    %18 = arith.cmpi eq, %15, %17 : vector<128x10xi32>
    %cst_8 = arith.constant 0.000000e+00 : f32
    %19 = vector.broadcast %cst_8 : f32 to vector<128x10xf32>
    %20 = arith.select %18, %10, %19 : vector<128x10xi1>, vector<128x10xf32>
    %cst_9 = arith.constant dense<0.000000e+00> : vector<128xf32>
    %21 = vector.multi_reduction <add>, %20, %cst_9 [1] : vector<128x10xf32> to vector<128xf32>
    %22 = vector.shape_cast %21 : vector<128xf32> to vector<128x1xf32>
    %23 = arith.subf %14, %22 : vector<128x1xf32>
    %24 = tpu.iota {dimensions = array<i32: 0>} : vector<128x1xi32>
    %c128_i32 = arith.constant 128 : i32
    %25 = arith.muli %arg0, %c128_i32 : i32
    %26 = vector.broadcast %25 : i32 to vector<128x1xi32>
    %27 = arith.addi %24, %26 : vector<128x1xi32>
    %c250_i32 = arith.constant 250 : i32
    %28 = vector.broadcast %c250_i32 : i32 to vector<128x1xi32>
    %29 = arith.cmpi slt, %27, %28 : vector<128x1xi32>
    %c0_10 = arith.constant 0 : index
    %c0_11 = arith.constant 0 : index
    %30 = vector.load %arg3[%c0_10, %c0_11] : memref<128x1xf32, #tpu.memory_space<vmem>>, vector<128x1xf32>
    %31 = arith.mulf %30, %23 : vector<128x1xf32>
    %cst_12 = arith.constant 0.000000e+00 : f32
    %32 = vector.broadcast %cst_12 : f32 to vector<128x1xf32>
    %33 = arith.select %29, %31, %32 : vector<128x1xi1>, vector<128x1xf32>
    %34 = vector.shape_cast %33 : vector<128x1xf32> to vector<1x128x1xf32>
    %cst_13 = arith.constant dense<0.000000e+00> : vector<1xf32>
    %35 = vector.multi_reduction <add>, %34, %cst_13 [1, 2] : vector<1x128x1xf32> to vector<1xf32>
    %36 = vector.shape_cast %35 : vector<1xf32> to vector<1x1x1xf32>
    %37 = vector.extract %36[0, 0, 0] : f32 from vector<1x1x1xf32>
    %38 = vector.broadcast %37 : f32 to vector<1x1x1xf32>
    %cst_14 = arith.constant 0.000000e+00 : f32
    %39 = vector.broadcast %cst_14 : f32 to vector<128x1xf32>
    %40 = arith.select %29, %30, %39 : vector<128x1xi1>, vector<128x1xf32>
    %41 = vector.shape_cast %40 : vector<128x1xf32> to vector<1x128x1xf32>
    %cst_15 = arith.constant dense<0.000000e+00> : vector<1xf32>
    %42 = vector.multi_reduction <add>, %41, %cst_15 [1, 2] : vector<1x128x1xf32> to vector<1xf32>
    %43 = vector.shape_cast %42 : vector<1xf32> to vector<1x1x1xf32>
    %44 = vector.extract %43[0, 0, 0] : f32 from vector<1x1x1xf32>
    %45 = vector.broadcast %44 : f32 to vector<1x1x1xf32>
    %46 = tpu.concatenate %38, %45 in 2 : vector<1x1x1xf32>, vector<1x1x1xf32> -> vector<1x1x2xf32>
    %c0_16 = arith.constant 0 : index
    %c0_17 = arith.constant 0 : index
    %c0_18 = arith.constant 0 : index
    %47 = vector.load %arg6[%c0_16, %c0_17, %c0_18] : memref<1x1x2xf32, #tpu.memory_space<vmem>>, vector<1x1x2xf32>
    tpu.vector_store %arg6[%c0_16, %c0_17, %c0_18], %46 {strides = array<i32>} : memref<1x1x2xf32, #tpu.memory_space<vmem>>, vector<1x1x2xf32>,
    return
  }
  func.func @transform_0(%arg0: i32) -> (i32, i32) {
    %c0_i32 = arith.constant 0 : i32
    %c0_i32_0 = arith.constant 0 : i32
    return %arg0, %c0_i32 : i32, i32
  }
  func.func @transform_1(%arg0: i32) -> (i32, i32) {
    %c0_i32 = arith.constant 0 : i32
    %c0_i32_0 = arith.constant 0 : i32
    return %arg0, %c0_i32 : i32, i32
  }
  func.func @transform_2(%arg0: i32) -> (i32, i32) {
    %c0_i32 = arith.constant 0 : i32
    %c0_i32_0 = arith.constant 0 : i32
    return %arg0, %c0_i32 : i32, i32
  }
  func.func @transform_3(%arg0: i32) -> (i32, i32) {
    %c0_i32 = arith.constant 0 : i32
    %c0_i32_0 = arith.constant 0 : i32
    %c0_i32_1 = arith.constant 0 : i32
    return %c0_i32, %c0_i32_0 : i32, i32
  }
  func.func @transform_4(%arg0: i32) -> (i32, i32) {
    %c0_i32 = arith.constant 0 : i32
    %c0_i32_0 = arith.constant 0 : i32
    %c0_i32_1 = arith.constant 0 : i32
    return %c0_i32, %c0_i32_0 : i32, i32
  }
  func.func @transform_5(%arg0: i32) -> (i32, i32, i32) {
    %c0_i32 = arith.constant 0 : i32
    %c0_i32_0 = arith.constant 0 : i32
    %c0_i32_1 = arith.constant 0 : i32
    return %arg0, %c0_i32, %c0_i32_0 : i32, i32, i32
  }
}

</mosaic_0001>

<bundles_post_ra>
// kernel: tpu_custom_call.1
= control target key start
LH: loop header
LB: loop body
LE: loop exit
PB: predicated region body
PF: predicated region fallthrough
CT: control target
= control target key end

     0   :  { %10 = vsyncpa [#allocation3], 0  ;;  %s1828_s0 = inlined_call_operand.vmem [shape: f32[250,10], index: 0, kind: input, shape index: {}]   ;;  %s1829_s1 = inlined_call_operand.vmem [shape: s32[250,1], index: 1, kind: input, shape index: {}]   ;;  %s1830_s2 = inlined_call_operand.vmem [shape: f32[250,1], index: 2, kind: input, shape index: {}]   ;;  %s1831_s3 = inlined_call_operand.vmem [shape: f32[1,10], index: 3, kind: input, shape index: {}]   ;;  %s1832_s4 = inlined_call_operand.vmem [shape: f32[1,10], index: 4, kind: input, shape index: {}]   ;;  %s1833_s5 = inlined_call_operand.hbm [shape: f32[2,1,2], index: 5, kind: output, shape index: {}]  }
   0x1   :  { %12 = vsyncpa [#allocation3 + $0x1], 0  ;;  %s1182_s18 = smov 0   ;;  %s1184_s19 = smov 0  }
   0x2   :  { %s1186_s20 = smov 0   ;;  %s1188_s21 = smov 0  }
   0x3 LB: > { %s1203_s22 = sadd.s32 4294967295, %s1148_s21   ;;  %s962_s23 = sadd.s32 4294967294, %s1148_s21   ;;  %s1148_s21 = sphi %s1188_s21, %s1841_s21   ;;  %s1144_s20 = sphi %s1186_s20, %s1840_s20   ;;  %s1140_s19 = sphi %s1184_s19, %s1839_s19   ;;  %s1136_s18 = sphi %s1182_s18, %s1838_s18  }
   0x4   : > { %s1207_s24 = sadd.s32 1, %s1148_s21   ;;  %s145_s25 = sadd.s32 1, %s1144_s20 }
   0x5   : > { %s142_s26 = ssub.s32 %s1148_s21, %s1207_s24  ;;  %p155_p0 = scmp.ne.s32.totalorder %s1144_s20, %s1140_s19 }
   0x6   : > { %p143_p1 = scmp.eq.s32.totalorder %s142_s26, 0  ;;  %p156_p2 = scmp.eq.s32.totalorder %s1203_s22, 1 }
   0x7   : > { %p161_p3 = scmp.ne.s32.totalorder %s1140_s19, %s1136_s18  ;;  %p162_p4 = scmp.eq.s32.totalorder %s962_s23, 1 }
   0x8   : > { %s1218_s27 = scalar_select %p143_p1, %s1144_s20, %s145_s25  }
   0x9   : > { %p1220_p5 = por %p156_p2, %p155_p0  ;;  %p1224_p6 = por %p162_p4, %p161_p3 }
   0xa   : > { %p965_p7 = scmp.ge.s32.totalorder %s1148_s21, 1  ;;  %p213_p8 = scmp.lt.s32.totalorder %s1148_s21, 3 }
   0xc   : > { %p214_p9 = pnand %p965_p7, %p213_p8 }
   0xd   : > { %s1231_s30 = sshll.u32 (!%p214_p9), %s1203_s22, 4  ;;  %s974_s23 = sshll.u32 (!%p214_p9), %s1203_s22, 7 }
   0xe   : > { %217 = sbr.rel (%p214_p9) target bundleno = 631 (0x277), region = 40  ;;  %p251_p10 = scmp.lt.s32.totalorder (!%p214_p9), %s1231_s30, 31 }
   0xf   : > { %s1792_s13 = scalar_lea.hbm (!%p214_p9), %s1833_s5, %s1231_s30  ;;  %s1151_s16 = smov (!%p214_p9), [#allocation2]  }
  0x13   : > { %v1150_v0 = vmov 0   ;;  %s252_s6 = scalar_select %p251_p10, %s1231_s30, 31  ;;  %v1240_v1 = vld [vmem:[%s1831_s3] ss:$0 sm:$0xff]  ;;  %vm330_vm0 = vcmask 80896   ;;  %vm768_vm13 = vcmask 7168  }
  0x14   : > { %1023 = vset.pattern.permute.xlu1 %v1150_v0  ;;  %1022 = vset.pattern.permute.xlu0 %v1150_v0  ;;  %v1251_v2 = vld [vmem:[%s1832_s4] ss:$0 sm:$0xff] }
  0x15   : > { %s1235_s7 = sshll.u32 %s252_s6, 3  ;;  %s248_s6 = sand.u32 1, %s1140_s19  }
  0x16   : > { %s1246_s12 = scalar_lea.vmem %s1828_s0, %s1235_s7  ;;  %s1369_s17 = scalar_lea.vmem %s1829_s1, %s1235_s7 }
  0x17   : > { %v270_v3 = vld [vmem:[%s1246_s12 + $0x10] sm:$0xff]  ;;  %v268_v4 = vld [vmem:[%s1246_s12] sm:$0xff]  ;;  %v271_v5 = vld [vmem:[%s1246_s12 + $0x18] sm:$0xff]  ;;  %s1491_s26 = scalar_lea.vmem %s1830_s2, %s1235_s7  ;;  %s249_s7 = scalar_lea.vmem [#allocation2], %s248_s6 }
  0x18   : > { %v293_v6 = vmul.f32 %v1240_v1, %v270_v3  ;;  %v291_v7 = vmul.f32 %v1240_v1, %v268_v4  ;;  %v294_v8 = vmul.f32 %v1240_v1, %v271_v5  ;;  %v269_v9 = vld [vmem:[%s1246_s12 + $0x8] sm:$0xff]  ;;  %v272_v11 = vld [vmem:[%s1246_s12 + $0x20] sm:$0xff]  ;;  %v275_v18 = vld [vmem:[%s1246_s12 + $0x38] sm:$0xff]  ;;  %s883_s8 = sshll.u32 %s249_s7, 4  ;;  %s871_s14 = scalar_lea.sflag [#allocation3], %s248_s6  ;;  %s884_s8 = int_to_ptr.vmem [resolvable:$true] %s883_s8 }
  0x19   : > { %v273_v10 = vld [vmem:[%s1246_s12 + $0x28] sm:$0xff]  ;;  %v292_v12 = vmul.f32 %v1240_v1, %v269_v9  ;;  %v295_v17 = vmul.f32 %v1240_v1, %v272_v11  ;;  %v274_v20 = vld [vmem:[%s1246_s12 + $0x30] sm:$0xff]  ;;  %v298_v24 = vmul.f32 %v1240_v1, %v275_v18  ;;  %v276_v30 = vld [vmem:[%s1246_s12 + $0x40] sm:$0xff]  ;;  %s1088_s15 = scalar_lea.vmem %s884_s8, 16 }
  0x1a   : > { %v296_v13 = vmul.f32 %v1240_v1, %v273_v10  ;;  %v1265_v14 = vadd.f32 %v1251_v2, %v293_v6  ;;  %v1268_v15 = vadd.f32 %v1251_v2, %v291_v7  ;;  %v1271_v16 = vadd.f32 %v1251_v2, %v294_v8  ;;  %v277_v29 = vld [vmem:[%s1246_s12 + $0x48] sm:$0xff]  ;;  %v279_v37 = vld [vmem:[%s1246_s12 + $0x58] sm:$0xff]  ;;  %v278_v38 = vld [vmem:[%s1246_s12 + $0x50] sm:$0xff]  ;;  %p1089_p11 = scmp.ne.s32.totalorder %s884_s8, %s1088_s15 }
  0x1b   : > { %v1276_v19 = vadd.f32 %v1251_v2, %v292_v12  ;;  %v1292_v27 = vadd.f32 %v1251_v2, %v295_v17  ;;  %v297_v28 = vmul.f32 %v1240_v1, %v274_v20  ;;  %v1300_v32 = vadd.f32 %v1251_v2, %v298_v24  ;;  %v281_v45 = vld [vmem:[%s1246_s12 + $0x68] sm:$0xff]  ;;  %v280_v46 = vld [vmem:[%s1246_s12 + $0x60] sm:$0xff]  ;;  %v283_v53 = vld [vmem:[%s1246_s12 + $0x78] sm:$0xff] }
  0x1c   : > { %v337_v21 = vsel %vm330_vm0, %v1265_v14, -inf  ;;  %v331_v22 = vsel %vm330_vm0, %v1268_v15, -inf  ;;  %v1284_v23 = vadd.f32 %v1251_v2, %v296_v13  ;;  %v340_v25 = vsel %vm330_vm0, %v1271_v16, -inf  ;;  %v282_v54 = vld [vmem:[%s1246_s12 + $0x70] sm:$0xff]  ;;  %v509_v5 = vld [vmem:[%s1369_s17] sm:$0xff]  ;;  %v512_v6 = vld [vmem:[%s1369_s17 + $0x18] sm:$0xff]  ;;  %p1090_p12 = pnand %p1089_p11, %p1220_p5 }
  0x1d   : > { %338 = vmax.xlane.f32.xlu1 %v337_v21  ;;  %332 = vmax.xlane.f32.xlu0 %v331_v22  ;;  %v334_v26 = vsel %vm330_vm0, %v1276_v19, -inf  ;;  %v343_v33 = vsel %vm330_vm0, %v1292_v27, -inf  ;;  %v1305_v34 = vadd.f32 %v1251_v2, %v297_v28  ;;  %v300_v35 = vmul.f32 %v1240_v1, %v277_v29  ;;  %v511_v4 = vld [vmem:[%s1369_s17 + $0x10] sm:$0xff]  ;;  %v518_v7 = vld [vmem:[%s1369_s17 + $0x48] sm:$0xff]  ;;  %v513_v8 = vld [vmem:[%s1369_s17 + $0x20] sm:$0xff] }
  0x1e   : > { %v346_v31 = vsel %vm330_vm0, %v1284_v23, -inf  ;;  %v299_v36 = vmul.f32 %v1240_v1, %v276_v30  ;;  %v352_v39 = vsel %vm330_vm0, %v1300_v32, -inf  ;;  %v302_v40 = vmul.f32 %v1240_v1, %v279_v37  ;;  %v520_v9 = vld [vmem:[%s1369_s17 + $0x58] sm:$0xff]  ;;  %v514_v10 = vld [vmem:[%s1369_s17 + $0x28] sm:$0xff]  ;;  %v515_v12 = vld [vmem:[%s1369_s17 + $0x30] sm:$0xff]  ;;  %p1091_p13 = pneg %p1090_p12 }
  0x1f   : > { %v349_v41 = vsel %vm330_vm0, %v1305_v34, -inf  ;;  %v1317_v42 = vadd.f32 %v1251_v2, %v300_v35  ;;  %v301_v44 = vmul.f32 %v1240_v1, %v278_v38  ;;  %v304_v47 = vmul.f32 %v1240_v1, %v281_v45  ;;  %v522_v11 = vld [vmem:[%s1369_s17 + $0x68] sm:$0xff]  ;;  %v524_v13 = vld [vmem:[%s1369_s17 + $0x78] sm:$0xff]  ;;  %v517_v18 = vld [vmem:[%s1369_s17 + $0x40] sm:$0xff] }
  0x20   : > { %v1320_v43 = vadd.f32 %v1251_v2, %v299_v36  ;;  %v303_v48 = vmul.f32 %v1240_v1, %v280_v46  ;;  %v1332_v51 = vadd.f32 %v1251_v2, %v302_v40  ;;  %v306_v56 = vmul.f32 %v1240_v1, %v283_v53  ;;  %v516_v17 = vld [vmem:[%s1369_s17 + $0x38] sm:$0xff]  ;;  %v519_v20 = vld [vmem:[%s1369_s17 + $0x50] sm:$0xff]  ;;  %v521_v21 = vld [vmem:[%s1369_s17 + $0x60] sm:$0xff] }
  0x21   : > { %341 = vmax.xlane.f32.xlu1 %v340_v25  ;;  %335 = vmax.xlane.f32.xlu0 %v334_v26  ;;  %v358_v49 = vsel %vm330_vm0, %v1317_v42, -inf  ;;  %v1335_v52 = vadd.f32 %v1251_v2, %v301_v44  ;;  %v1340_v55 = vadd.f32 %v1251_v2, %v304_v47  ;;  %v305_v60 = vmul.f32 %v1240_v1, %v282_v54  ;;  %v523_v22 = vld [vmem:[%s1369_s17 + $0x70] sm:$0xff] }
  0x22   : > { %v355_v50 = vsel %vm330_vm0, %v1320_v43, -inf  ;;  %v364_v57 = vsel %vm330_vm0, %v1332_v51, -inf  ;;  %v1348_v59 = vadd.f32 %v1251_v2, %v303_v48  ;;  %v1356_v63 = vadd.f32 %v1251_v2, %v306_v56 }
  0x23   : > { %v361_v58 = vsel %vm330_vm0, %v1335_v52, -inf  ;;  %v370_v61 = vsel %vm330_vm0, %v1340_v55, -inf  ;;  %v1359_v0 = vadd.f32 %v1251_v2, %v305_v60  ;;  %v510_v2 = vld [vmem:[%s1369_s17 + $0x8] sm:$0xff]  ;;  %v507_v45 = vlaneseq  ;;  %s1092_s17 = sshll.u32 %s1151_s16, 4  ;;  %s1093_s17 = int_to_ptr.vmem [resolvable:$false] %s1092_s17 }
  0x24   : > { %v367_v62 = vsel %vm330_vm0, %v1348_v59, -inf  ;;  %v376_v3 = vsel %vm330_vm0, %v1356_v63, -inf  ;;  %p1095_p0 = scmp.lt.s32.totalorder %s884_s8, %s1093_s17 }
  0x25   : > { %347 = vmax.xlane.f32.xlu1 %v346_v31  ;;  %344 = vmax.xlane.f32.xlu0 %v343_v33  ;;  %v373_v1 = vsel %vm330_vm0, %v1359_v0, -inf }
  0x29   : > { %353 = vmax.xlane.f32.xlu1 %v352_v39  ;;  %350 = vmax.xlane.f32.xlu0 %v349_v41 }
  0x2d   : > { %359 = vmax.xlane.f32.xlu1 %v358_v49  ;;  %356 = vmax.xlane.f32.xlu0 %v355_v50 }
  0x31   : > { %365 = vmax.xlane.f32.xlu1 %v364_v57  ;;  %362 = vmax.xlane.f32.xlu0 %v361_v58 }
  0x35   : > { %371 = vmax.xlane.f32.xlu1 %v370_v61  ;;  %368 = vmax.xlane.f32.xlu0 %v367_v62 }
  0x39   : > { %377 = vmax.xlane.f32.xlu1 %v376_v3  ;;  %374 = vmax.xlane.f32.xlu0 %v373_v1 }
  0x4a   : > { %529 = vperm.xlu1 %1023, %v510_v2  }
  0x4e   : > { %532 = vperm.xlu1 %1023, %v511_v4  }
  0x4f   : > { %526 = vperm.xlu0 %1022, %v509_v5  }
  0x52   : > { %535 = vperm.xlu1 %1023, %v512_v6  }
  0x53   : > { %553 = vperm.xlu0 %1022, %v518_v7  }
  0x56   : > { %538 = vperm.xlu1 %1023, %v513_v8  }
  0x57   : > { %559 = vperm.xlu0 %1022, %v520_v9  }
  0x5a   : > { %541 = vperm.xlu1 %1023, %v514_v10  }
  0x5b   : > { %565 = vperm.xlu0 %1022, %v522_v11  }
  0x5e   : > { %544 = vperm.xlu1 %1023, %v515_v12  }
  0x5f   : > { %571 = vperm.xlu0 %1022, %v524_v13  }
  0x62   : > { %547 = vperm.xlu1 %1023, %v516_v17  }
  0x66   : > { %550 = vperm.xlu1 %1023, %v517_v18  }
  0x6a   : > { %556 = vperm.xlu1 %1023, %v519_v20  }
  0x6e   : > { %562 = vperm.xlu1 %1023, %v521_v21  }
  0x72   : > { %568 = vperm.xlu1 %1023, %v523_v22  }
  0xa6   : > { %v339_v24 = vpop.xlane.xlu1 %338  ;;  %v333_v25 = vpop.xlane.xlu0 %332 }
  0xa7   : > { %v381_v40 = vsub.f32 %v1265_v14, %v339_v24  ;;  %v379_v47 = vsub.f32 %v1268_v15, %v333_v25 }
  0xa9   : > { %v399_v46 = vmul.f32 1.442695, %v381_v40  ;;  %v395_v14 = vmul.f32 1.442695, %v379_v47 }
  0xaa   : > { %v342_v26 = vpop.xlane.xlu1 %341  ;;  %v336_v28 = vpop.xlane.xlu0 %335 }
  0xab   : > { %v380_v37 = vsub.f32 %v1276_v19, %v336_v28  ;;  %v382_v53 = vsub.f32 %v1271_v16, %v342_v26  ;;  %v1397_v19 = vand.u32 127, %v507_v45 }
  0xad   : > { %v397_v41 = vmul.f32 1.442695, %v380_v37  ;;  %v401_v58 = vmul.f32 1.442695, %v382_v53 }
  0xae   : > { %v348_v29 = vpop.xlane.xlu1 %347  ;;  %v345_v30 = vpop.xlane.xlu0 %344 }
  0xaf   : > { %1024 = vpow2.f32 %v397_v41  ;;  %v383_v49 = vsub.f32 %v1292_v27, %v345_v30  ;;  %v1405_v60 = vsub.f32 %v1284_v23, %v348_v29 }
  0xb0   : > { %1026 = vpow2.f32 %v399_v46 }
  0xb1   : > { %v403_v56 = vmul.f32 1.442695, %v383_v49  ;;  %1028 = vpow2.f32 %v395_v14  ;;  %v405_v1 = vmul.f32 1.442695, %v1405_v60 }
  0xb2   : > { %v354_v31 = vpop.xlane.xlu1 %353  ;;  %v351_v33 = vpop.xlane.xlu0 %350 }
  0xb3   : > { %v1400_v54 = vsub.f32 %v1305_v34, %v351_v33  ;;  %1030 = vpow2.f32 %v403_v56  ;;  %v1417_v23 = vsub.f32 %v1300_v32, %v354_v31 }
  0xb4   : > { %1032 = vpow2.f32 %v401_v58 }
  0xb5   : > { %v407_v16 = vmul.f32 1.442695, %v1400_v54  ;;  %v409_v32 = vmul.f32 1.442695, %v1417_v23 }
  0xb6   : > { %v360_v35 = vpop.xlane.xlu1 %359  ;;  %v357_v36 = vpop.xlane.xlu0 %356 }
  0xb7   : > { %v1410_v61 = vsub.f32 %v1320_v43, %v357_v36  ;;  %1034 = vpow2.f32 %v407_v16  ;;  %v1428_v10 = vsub.f32 %v1317_v42, %v360_v35 }
  0xb8   : > { %1036 = vpow2.f32 %v405_v1 }
  0xb9   : > { %v411_v43 = vmul.f32 1.442695, %v1410_v61  ;;  %v413_v42 = vmul.f32 1.442695, %v1428_v10 }
  0xba   : > { %v366_v38 = vpop.xlane.xlu1 %365  ;;  %v363_v39 = vpop.xlane.xlu0 %362 }
  0xbb   : > { %v1421_v5 = vsub.f32 %v1335_v52, %v363_v39  ;;  %v1431_v11 = vsub.f32 %v1332_v51, %v366_v38  ;;  %1038 = vpow2.f32 %v411_v43 }
  0xbc   : > { %v1025_v8 = vpop.eup %1024  ;;  %1040 = vpow2.f32 %v409_v32 }
  0xbd   : > { %v1027_v12 = vpop.eup %1026  ;;  %v415_v13 = vmul.f32 1.442695, %v1421_v5  ;;  %v430_v18 = vsel %vm330_vm0, %v1025_v8, 0.0  ;;  %v417_v24 = vmul.f32 1.442695, %v1431_v11 }
  0xbe   : > { %v1389_v44 = vpop.xlane.xlu1 %371  ;;  %v369_v48 = vpop.xlane.xlu0 %368  ;;  %v433_v51 = vsel %vm330_vm0, %v1027_v12, 0.0 }
  0xbf   : > { %v1029_v22 = vpop.eup %1028  ;;  %1042 = vpow2.f32 %v415_v13  ;;  %v1441_v25 = vsub.f32 %v1348_v59, %v369_v48  ;;  %v1447_v33 = vsub.f32 %v1340_v55, %v1389_v44 }
  0xc0   : > { %v1031_v28 = vpop.eup %1030  ;;  %1044 = vpow2.f32 %v413_v42  ;;  %v427_v30 = vsel %vm330_vm0, %v1029_v22, 0.0 }
  0xc1   : > { %v1033_v29 = vpop.eup %1032  ;;  %1046 = vpow2.f32 %v417_v24  ;;  %v419_v35 = vmul.f32 1.442695, %v1441_v25  ;;  %v439_v59 = vsel %vm330_vm0, %v1031_v28, 0.0  ;;  %v421_v39 = vmul.f32 1.442695, %v1447_v33 }
  0xc2   : > { %v1393_v50 = vpop.xlane.xlu1 %377  ;;  %v1402_v57 = vpop.xlane.xlu0 %374  ;;  %v436_v38 = vsel %vm330_vm0, %v1033_v29, 0.0 }
  0xc3   : > { %1048 = vpow2.f32 %v419_v35  ;;  %v1461_v48 = vsub.f32 %v1356_v63, %v1393_v50  ;;  %v1469_v50 = vshrl.u32 %v507_v45, 7  ;;  %v1532_v35 = vld [vmem:[%s1491_s26] sm:$0xff] }
  0xc4   : > { %v1035_v31 = vpop.eup %1034  ;;  %1050 = vpow2.f32 %v421_v39 }
  0xc5   : > { %v445_v55 = vsel %vm330_vm0, %v1035_v31, 0.0  ;;  %v425_v56 = vmul.f32 1.442695, %v1461_v48  ;;  %v671_v1 = vadd.s32 8, %v1469_v50  ;;  %v673_v39 = vadd.s32 24, %v1469_v50 }
  0xc6   : > { %v530_v15 = vpop.permute.xlu1 %529 }
  0xc7   : > { %vm574_vm1 = vcmp.eq.s32.totalorder %v1397_v19, %v530_v15 }
  0xc8   : > { %v590_v27 = vsel %vm574_vm1, %v380_v37, 0.0  ;;  %v1037_v37 = vpop.eup %1036 }
  0xc9   : > { %v608_v34 = vsel %vm330_vm0, %v590_v27, 0.0  ;;  %v1039_v41 = vpop.eup %1038  ;;  %v442_v46 = vsel %vm330_vm0, %v1037_v37, 0.0 }
  0xca   : > { %v533_v62 = vpop.permute.xlu1 %532  ;;  %609 = vadd.xlane.f32.xlu1 %v608_v34  ;;  %v527_v3 = vpop.permute.xlu0 %526 }
  0xcb   : > { %vm575_vm2 = vcmp.eq.s32.totalorder %v1397_v19, %v533_v62  ;;  %vm573_vm3 = vcmp.eq.s32.totalorder %v1397_v19, %v527_v3 }
  0xcc   : > { %v591_v2 = vsel %vm575_vm2, %v381_v40, 0.0  ;;  %v589_v4 = vsel %vm573_vm3, %v379_v47, 0.0  ;;  %v1455_v40 = vsub.f32 %v1359_v0, %v1402_v57  ;;  %v1041_v47 = vpop.eup %1040 }
  0xcd   : > { %v611_v6 = vsel %vm330_vm0, %v591_v2, 0.0  ;;  %v605_v7 = vsel %vm330_vm0, %v589_v4, 0.0  ;;  %v1043_v0 = vpop.eup %1042  ;;  %v448_v57 = vsel %vm330_vm0, %v1041_v47, 0.0  ;;  %v1478_v4 = vstv %s974_s23  ;;  %v1551_v47 = vld [vmem:[%s1491_s26 + $0x20] sm:$0xff]  ;;  %s1094_s23 = scalar_lea.vmem %s1093_s17, 32 }
  0xce   : > { %v536_v9 = vpop.permute.xlu1 %535  ;;  %612 = vadd.xlane.f32.xlu1 %v611_v6  ;;  %606 = vadd.xlane.f32.xlu0 %v605_v7  ;;  %v1045_v14 = vpop.eup %1044  ;;  %v457_v15 = vsel %vm330_vm0, %v1043_v0, 0.0  ;;  %v1515_v24 = vadd.s32 %v1478_v4, %v1469_v50  ;;  %p1096_p1 = scmp.lt.s32.totalorder %s1094_s23, %s1088_s15 }
  0xcf   : > { %vm576_vm4 = vcmp.eq.s32.totalorder %v1397_v19, %v536_v9  ;;  %v1047_v58 = vpop.eup %1046  ;;  %v554_v16 = vpop.permute.xlu0 %553  ;;  %v454_v27 = vsel %vm330_vm0, %v1045_v14, 0.0  ;;  %v672_v9 = vadd.s32 16, %v1469_v50 }
  0xd0   : > { %v592_v52 = vsel %vm576_vm4, %v382_v53, 0.0  ;;  %v451_v53 = vsel %vm330_vm0, %v1039_v41, 0.0  ;;  %v460_v34 = vsel %vm330_vm0, %v1047_v58, 0.0  ;;  %v1049_v62 = vpop.eup %1048  ;;  %vm582_vm9 = vcmp.eq.s32.totalorder %v1397_v19, %v554_v16  ;;  %p1097_p2 = por %p1096_p1, %p1095_p0 }
  0xd1   : > { %v614_v17 = vsel %vm330_vm0, %v592_v52, 0.0  ;;  %v463_v6 = vsel %vm330_vm0, %v1049_v62, 0.0  ;;  %v1051_v7 = vpop.eup %1050  ;;  %v598_v42 = vsel %vm582_vm9, %v1428_v10, 0.0  ;;  %v1520_v10 = vld [vmem:[%s1491_s26 + $0x10] sm:$0xff]  ;;  %vm704_vm15 = vcmp.lt.s32.totalorder %v1515_v24, 250 }
  0xd2   : > { %v539_v20 = vpop.permute.xlu1 %538  ;;  %615 = vadd.xlane.f32.xlu1 %v614_v17  ;;  %431 = vadd.xlane.f32.xlu0 %v430_v18  ;;  %v466_v52 = vsel %vm330_vm0, %v1051_v7, 0.0  ;;  %v1499_v18 = vadd.s32 %v1478_v4, %v672_v9  ;;  %v632_v29 = vsel %vm330_vm0, %v598_v42, 0.0  ;;  %v677_v7 = vadd.s32 56, %v1469_v50  ;;  %v1617_v42 = vld [vmem:[%s1491_s26 + $0x38] sm:$0xff]  ;;  %p1098_p3 = pnand %p1097_p2, %p1091_p13 }
  0xd3   : > { %vm577_vm5 = vcmp.eq.s32.totalorder %v1397_v19, %v539_v20  ;;  %v560_v45 = vpop.permute.xlu0 %559  ;;  %v1503_v20 = vld [vmem:[%s1491_s26 + $0x8] sm:$0xff] }
  0xd4   : > { %v593_v21 = vsel %vm577_vm5, %v383_v49, 0.0  ;;  %v423_v49 = vmul.f32 1.442695, %v1455_v40  ;;  %vm584_vm11 = vcmp.eq.s32.totalorder %v1397_v19, %v560_v45  ;;  %vm706_vm14 = vcmp.lt.s32.totalorder %v1499_v18, 250 }
  0xd5   : > { %v617_v26 = vsel %vm330_vm0, %v593_v21, 0.0  ;;  %v812_v31 = vsel %vm706_vm14, %v1520_v10, 0.0  ;;  %v600_v37 = vsel %vm584_vm11, %v1431_v11, 0.0 }
  0xd6   : > { %618 = vadd.xlane.f32.xlu1 %v617_v26  ;;  %434 = vadd.xlane.f32.xlu0 %v433_v51  ;;  %v542_v36 = vpop.permute.xlu1 %541  ;;  %1052 = vpow2.f32 %v423_v49  ;;  %v674_v51 = vadd.s32 32, %v1469_v50  ;;  %v829_v11 = vsel %vm768_vm13, %v812_v31, 0.0  ;;  %v1554_v49 = vadd.s32 %v1478_v4, %v673_v39 }
  0xd7   : > { %vm578_vm6 = vcmp.eq.s32.totalorder %v1397_v19, %v542_v36  ;;  %1054 = vpow2.f32 %v425_v56  ;;  %v566_v12 = vpop.permute.xlu0 %565  ;;  %v1567_v56 = vld [vmem:[%s1491_s26 + $0x18] sm:$0xff] }
  0xd8   : > { %v594_v3 = vsel %vm578_vm6, %v1405_v60, 0.0  ;;  %v1485_v60 = vadd.s32 %v1478_v4, %v671_v1  ;;  %v1523_v28 = vadd.s32 %v1478_v4, %v674_v51  ;;  %vm586_vm1 = vcmp.eq.s32.totalorder %v1397_v19, %v566_v12 }
  0xd9   : > { %v620_v43 = vsel %vm330_vm0, %v594_v3, 0.0  ;;  %vm707_vm5 = vcmp.lt.s32.totalorder %v1554_v49, 250 }
  0xda   : > { %428 = vadd.xlane.f32.xlu1 %v427_v30  ;;  %440 = vadd.xlane.f32.xlu0 %v439_v59  ;;  %v545_v44 = vpop.permute.xlu1 %544  ;;  %vm705_vm10 = vcmp.lt.s32.totalorder %v1485_v60, 250  ;;  %vm708_vm3 = vcmp.lt.s32.totalorder %v1523_v28, 250  ;;  %v813_v58 = vsel %vm707_vm5, %v1567_v56, 0.0 }
  0xdb   : > { %vm579_vm7 = vcmp.eq.s32.totalorder %v1397_v19, %v545_v44  ;;  %v811_v21 = vsel %vm705_vm10, %v1503_v20, 0.0  ;;  %v572_v59 = vpop.permute.xlu0 %571  ;;  %v814_v0 = vsel %vm708_vm3, %v1551_v47, 0.0 }
  0xdc   : > { %v595_v8 = vsel %vm579_vm7, %v1400_v54, 0.0  ;;  %v827_v30 = vsel %vm768_vm13, %v811_v21, 0.0  ;;  %vm588_vm4 = vcmp.eq.s32.totalorder %v1397_v19, %v572_v59  ;;  %v833_v62 = vsel %vm768_vm13, %v814_v0, 0.0  ;;  %v1636_v59 = vld [vmem:[%s1491_s26 + $0x40] sm:$0xff] }
  0xdd   : > { %v623_v32 = vsel %vm330_vm0, %v595_v8, 0.0  ;;  %v604_v1 = vsel %vm588_vm4, %v1461_v48, 0.0  ;;  %v1603_v48 = vld [vmem:[%s1491_s26 + $0x30] sm:$0xff]  ;;  %v679_v21 = vadd.s32 72, %v1469_v50  ;;  %v682_v0 = vadd.s32 96, %v1469_v50 }
  0xde   : > { %437 = vadd.xlane.f32.xlu1 %v436_v38  ;;  %446 = vadd.xlane.f32.xlu0 %v445_v55  ;;  %v548_v63 = vpop.permute.xlu1 %547  ;;  %v810_v38 = vsel %vm704_vm15, %v1532_v35, 0.0 }
  0xdf   : > { %vm580_vm8 = vcmp.eq.s32.totalorder %v1397_v19, %v548_v63  ;;  %v826_v44 = vsel %vm768_vm13, %v810_v38, 0.0  ;;  %v1632_v31 = vadd.s32 %v1478_v4, %v679_v21  ;;  %v681_v38 = vadd.s32 88, %v1469_v50 }
  0xe0   : > { %v596_v17 = vsel %vm580_vm8, %v1417_v23, 0.0 }
  0xe1   : > { %v626_v23 = vsel %vm330_vm0, %v596_v17, 0.0  ;;  %v650_v17 = vsel %vm330_vm0, %v604_v1, 0.0  ;;  %v1685_v1 = vld [vmem:[%s1491_s26 + $0x60] sm:$0xff] }
  0xe2   : > { %443 = vadd.xlane.f32.xlu1 %v442_v46  ;;  %452 = vadd.xlane.f32.xlu0 %v451_v53  ;;  %v551_v2 = vpop.permute.xlu1 %550  ;;  %v828_v46 = vadd.f32 %v827_v30, %v826_v44  ;;  %v638_v53 = vsel %vm330_vm0, %v600_v37, 0.0  ;;  %v1644_v37 = vld [vmem:[%s1491_s26 + $0x48] sm:$0xff] }
  0xe3   : > { %v1053_v54 = vpop.eup %1052  ;;  %vm581_vm12 = vcmp.eq.s32.totalorder %v1397_v19, %v551_v2 }
  0xe4   : > { %v469_v22 = vsel %vm330_vm0, %v1053_v54, 0.0  ;;  %v1055_v26 = vpop.eup %1054  ;;  %v597_v41 = vsel %vm581_vm12, %v1410_v61, 0.0  ;;  %v602_v61 = vsel %vm586_vm1, %v1447_v33, 0.0  ;;  %v830_v16 = vadd.f32 %v829_v11, %v828_v46 }
  0xe5   : > { %v472_v55 = vsel %vm330_vm0, %v1055_v26, 0.0  ;;  %v629_v14 = vsel %vm330_vm0, %v597_v41, 0.0  ;;  %v678_v54 = vadd.s32 64, %v1469_v50  ;;  %vm713_vm1 = vcmp.lt.s32.totalorder %v1632_v31, 250 }
  0xe6   : > { %449 = vadd.xlane.f32.xlu1 %v448_v57  ;;  %458 = vadd.xlane.f32.xlu0 %v457_v15  ;;  %v557_v13 = vpop.permute.xlu1 %556  ;;  %v675_v57 = vadd.s32 40, %v1469_v50  ;;  %v676_v15 = vadd.s32 48, %v1469_v50  ;;  %v819_v44 = vsel %vm713_vm1, %v1644_v37, 0.0 }
  0xe7   : > { %vm583_vm2 = vcmp.eq.s32.totalorder %v1397_v19, %v557_v13  ;;  %v1621_v51 = vadd.s32 %v1478_v4, %v678_v54  ;;  %v843_v46 = vsel %vm768_vm13, %v819_v44, 0.0 }
  0xe8   : > { %v599_v33 = vsel %vm583_vm2, %v1421_v5, 0.0  ;;  %v1584_v3 = vadd.s32 %v1478_v4, %v676_v15  ;;  %v644_v5 = vsel %vm330_vm0, %v602_v61, 0.0  ;;  %v1661_v61 = vld [vmem:[%s1491_s26 + $0x50] sm:$0xff]  ;;  %v1669_v15 = vld [vmem:[%s1491_s26 + $0x58] sm:$0xff] }
  0xe9   : > { %v635_v2 = vsel %vm330_vm0, %v599_v33, 0.0  ;;  %vm712_vm12 = vcmp.lt.s32.totalorder %v1621_v51, 250  ;;  %v683_v33 = vadd.s32 104, %v1469_v50 }
  0xea   : > { %455 = vadd.xlane.f32.xlu1 %v454_v27  ;;  %461 = vadd.xlane.f32.xlu0 %v460_v34  ;;  %v563_v36 = vpop.permute.xlu1 %562  ;;  %v831_v27 = vsel %vm768_vm13, %v813_v58, 0.0  ;;  %v1580_v34 = vadd.s32 %v1478_v4, %v675_v57  ;;  %vm710_vm9 = vcmp.lt.s32.totalorder %v1584_v3, 250 }
  0xeb   : > { %vm585_vm6 = vcmp.eq.s32.totalorder %v1397_v19, %v563_v36  ;;  %v832_v45 = vadd.f32 %v831_v27, %v830_v16  ;;  %v818_v36 = vsel %vm712_vm12, %v1636_v59, 0.0  ;;  %v1674_v16 = vadd.s32 %v1478_v4, %v682_v0 }
  0xec   : > { %vm709_vm7 = vcmp.lt.s32.totalorder %v1580_v34, 250  ;;  %v841_v39 = vsel %vm768_vm13, %v818_v36, 0.0 }
  0xed   : > { %v834_v9 = vadd.f32 %v833_v62, %v832_v45  ;;  %vm1834_vm4 = vcmp.lt.s32.totalorder %v1674_v16, 250  ;;  %v684_v45 = vadd.s32 112, %v1469_v50 }
  0xee   : > { %621 = vadd.xlane.f32.xlu1 %v620_v43  ;;  %464 = vadd.xlane.f32.xlu0 %v463_v6  ;;  %v569_v63 = vpop.permute.xlu1 %568  ;;  %v601_v43 = vsel %vm585_vm6, %v1441_v25, 0.0  ;;  %v1594_v6 = vld [vmem:[%s1491_s26 + $0x28] sm:$0xff] }
  0xef   : > { %vm587_vm8 = vcmp.eq.s32.totalorder %v1397_v19, %v569_v63  ;;  %v815_v8 = vsel %vm709_vm7, %v1594_v6, 0.0  ;;  %v680_v19 = vadd.s32 80, %v1469_v50 }
  0xf0   : > { %v835_v25 = vsel %vm768_vm13, %v815_v8, 0.0 }
  0xf1   : > { %v836_v12 = vadd.f32 %v835_v25, %v834_v9  ;;  %v1697_v9 = vadd.s32 %v1478_v4, %v684_v45  ;;  %v685_v25 = vadd.s32 120, %v1469_v50 }
  0xf2   : > { %624 = vadd.xlane.f32.xlu1 %v623_v32  ;;  %467 = vadd.xlane.f32.xlu0 %v466_v52  ;;  %v816_v32 = vsel %vm710_vm9, %v1603_v48, 0.0  ;;  %v1610_v52 = vadd.s32 %v1478_v4, %v677_v7  ;;  %v1693_v7 = vld [vmem:[%s1491_s26 + $0x68] sm:$0xff] }
  0xf3   : > { %v837_v13 = vsel %vm768_vm13, %v816_v32, 0.0  ;;  %v1712_v21 = vadd.s32 %v1478_v4, %v685_v25 }
  0xf4   : > { %vm711_vm11 = vcmp.lt.s32.totalorder %v1610_v52, 250  ;;  %v838_v26 = vadd.f32 %v837_v13, %v836_v12  ;;  %v1705_v13 = vld [vmem:[%s1491_s26 + $0x78] sm:$0xff] }
  0xf6   : > { %627 = vadd.xlane.f32.xlu1 %v626_v23  ;;  %470 = vadd.xlane.f32.xlu0 %v469_v22  ;;  %v641_v23 = vsel %vm330_vm0, %v601_v43, 0.0  ;;  %v603_v22 = vsel %vm587_vm8, %v1455_v40, 0.0  ;;  %vm718_vm8 = vcmp.lt.s32.totalorder %v1697_v9, 250 }
  0xf7   : > { %v647_v41 = vsel %vm330_vm0, %v603_v22, 0.0 }
  0xfa   : > { %473 = vadd.xlane.f32.xlu0 %v472_v55  ;;  %633 = vadd.xlane.f32.xlu1 %v632_v29  ;;  %v817_v29 = vsel %vm711_vm11, %v1617_v42, 0.0  ;;  %v1649_v55 = vadd.s32 %v1478_v4, %v680_v19 }
  0xfb   : > { %v839_v30 = vsel %vm768_vm13, %v817_v29, 0.0 }
  0xfc   : > { %v840_v40 = vadd.f32 %v839_v30, %v838_v26  ;;  %vm714_vm2 = vcmp.lt.s32.totalorder %v1649_v55, 250 }
  0xfe   : > { %630 = vadd.xlane.f32.xlu0 %v629_v14  ;;  %639 = vadd.xlane.f32.xlu1 %v638_v53  ;;  %v842_v11 = vadd.f32 %v841_v39, %v840_v40  ;;  %v1657_v53 = vadd.s32 %v1478_v4, %v681_v38  ;;  %v820_v14 = vsel %vm714_vm2, %v1661_v61, 0.0 }
  0xff   : > { %v845_v58 = vsel %vm768_vm13, %v820_v14, 0.0 }
 0x100   : > { %v844_v57 = vadd.f32 %v843_v46, %v842_v11  ;;  %vm715_vm0 = vcmp.lt.s32.totalorder %v1657_v53, 250 }
 0x101   : > { %v821_v63 = vsel %vm715_vm0, %v1669_v15, 0.0 }
 0x102   : > { %636 = vadd.xlane.f32.xlu0 %v635_v2  ;;  %645 = vadd.xlane.f32.xlu1 %v644_v5  ;;  %v846_v27 = vadd.f32 %v845_v58, %v844_v57  ;;  %v847_v62 = vsel %vm768_vm13, %v821_v63, 0.0  ;;  %v1681_v5 = vadd.s32 %v1478_v4, %v683_v33  ;;  %v822_v2 = vsel %vm1834_vm4, %v1685_v1, 0.0 }
 0x103   : > { %v849_v8 = vsel %vm768_vm13, %v822_v2, 0.0  ;;  %vm719_vm4 = vcmp.lt.s32.totalorder %v1712_v21, 250 }
 0x104   : > { %v848_v43 = vadd.f32 %v847_v62, %v846_v27  ;;  %vm717_vm6 = vcmp.lt.s32.totalorder %v1681_v5, 250  ;;  %v825_v26 = vsel %vm719_vm4, %v1705_v13, 0.0 }
 0x105   : > { %v823_v32 = vsel %vm717_vm6, %v1693_v7, 0.0  ;;  %v855_v30 = vsel %vm768_vm13, %v825_v26, 0.0 }
 0x106   : > { %642 = vadd.xlane.f32.xlu0 %v641_v23  ;;  %651 = vadd.xlane.f32.xlu1 %v650_v17  ;;  %v850_v54 = vadd.f32 %v849_v8, %v848_v43  ;;  %v851_v12 = vsel %vm768_vm13, %v823_v32, 0.0  ;;  %v1709_v17 = vld [vmem:[%s1491_s26 + $0x70] sm:$0xff] }
 0x107   : > { %v824_v50 = vsel %vm718_vm8, %v1709_v17, 0.0 }
 0x108   : > { %v852_v23 = vadd.f32 %v851_v12, %v850_v54  ;;  %v853_v22 = vsel %vm768_vm13, %v824_v50, 0.0 }
 0x10a   : > { %648 = vadd.xlane.f32.xlu0 %v647_v41  ;;  %v854_v29 = vadd.f32 %v853_v22, %v852_v23 }
 0x10c   : > { %v856_v19 = vadd.f32 %v855_v30, %v854_v29 }
 0x10e   : > { %857 = vadd.xlane.f32.xlu1 %v856_v19 }
 0x153   : > { %v610_v4 = vpop.xlane.xlu1 %609 }
 0x157   : > { %v613_v40 = vpop.xlane.xlu1 %612  ;;  %v607_v36 = vpop.xlane.xlu0 %606 }
 0x15b   : > { %v616_v38 = vpop.xlane.xlu1 %615  ;;  %v432_v39 = vpop.xlane.xlu0 %431 }
 0x15c   : > { %1056 = vlog2.f32 %v432_v39 }
 0x15f   : > { %v619_v41 = vpop.xlane.xlu1 %618  ;;  %v435_v44 = vpop.xlane.xlu0 %434 }
 0x160   : > { %1058 = vlog2.f32 %v435_v44 }
 0x163   : > { %v429_v11 = vpop.xlane.xlu1 %428  ;;  %v441_v46 = vpop.xlane.xlu0 %440 }
 0x164   : > { %1060 = vlog2.f32 %v429_v11 }
 0x165   : > { %1062 = vlog2.f32 %v441_v46 }
 0x167   : > { %v438_v0 = vpop.xlane.xlu1 %437  ;;  %v447_v14 = vpop.xlane.xlu0 %446 }
 0x168   : > { %1064 = vlog2.f32 %v438_v0 }
 0x169   : > { %v1057_v57 = vpop.eup %1056  ;;  %1066 = vlog2.f32 %v447_v14 }
 0x16a   : > { %v478_v33 = vmul.f32 0.6931472, %v1057_v57 }
 0x16b   : > { %v444_v58 = vpop.xlane.xlu1 %443  ;;  %v453_v63 = vpop.xlane.xlu0 %452 }
 0x16c   : > { %1068 = vlog2.f32 %v444_v58  ;;  %v654_v62 = vsub.f32 %v478_v33, %v610_v4 }
 0x16d   : > { %v1059_v27 = vpop.eup %1058 }
 0x16e   : > { %v480_v45 = vmul.f32 0.6931472, %v1059_v27  ;;  %v737_v54 = vmul.f32 %v1503_v20, %v654_v62 }
 0x16f   : > { %v450_v2 = vpop.xlane.xlu1 %449  ;;  %v459_v43 = vpop.xlane.xlu0 %458 }
 0x170   : > { %v655_v8 = vsub.f32 %v480_v45, %v613_v40  ;;  %1070 = vlog2.f32 %v450_v2  ;;  %v753_v4 = vsel %vm705_vm10, %v737_v54, 0.0  ;;  %vm1837_vm10 = vcmp.lt.s32.totalorder %v1674_v16, 250 }
 0x171   : > { %v1061_v25 = vpop.eup %1060  ;;  %v770_v60 = vsel %vm768_vm13, %v753_v4, 0.0 }
 0x172   : > { %v1063_v32 = vpop.eup %1062  ;;  %v476_v12 = vmul.f32 0.6931472, %v1061_v25  ;;  %v738_v26 = vmul.f32 %v1520_v10, %v655_v8 }
 0x173   : > { %v484_v50 = vmul.f32 0.6931472, %v1063_v32  ;;  %v456_v23 = vpop.xlane.xlu1 %455  ;;  %v462_v22 = vpop.xlane.xlu0 %461 }
 0x174   : > { %v653_v29 = vsub.f32 %v476_v12, %v607_v36  ;;  %1072 = vlog2.f32 %v456_v23  ;;  %v754_v10 = vsel %vm706_vm14, %v738_v26, 0.0  ;;  %vm868_vm14 = vcmask 8192  }
 0x175   : > { %v1065_v30 = vpop.eup %1064  ;;  %v657_v19 = vsub.f32 %v484_v50, %v619_v41  ;;  %1074 = vlog2.f32 %v453_v63  ;;  %v772_v58 = vsel %vm768_vm13, %v754_v10, 0.0 }
 0x176   : > { %v736_v40 = vmul.f32 %v1532_v35, %v653_v29  ;;  %v482_v39 = vmul.f32 0.6931472, %v1065_v30  ;;  %1076 = vlog2.f32 %v462_v22  ;;  %v1067_v44 = vpop.eup %1066 }
 0x177   : > { %v740_v20 = vmul.f32 %v1551_v47, %v657_v19  ;;  %v622_v11 = vpop.xlane.xlu1 %621  ;;  %v465_v46 = vpop.xlane.xlu0 %464  ;;  %1078 = vlog2.f32 %v459_v43  ;;  %v488_v47 = vmul.f32 0.6931472, %v1067_v44 }
 0x178   : > { %v752_v36 = vsel %vm704_vm15, %v736_v40, 0.0  ;;  %v656_v41 = vsub.f32 %v482_v39, %v616_v38 }
 0x179   : > { %v1069_v0 = vpop.eup %1068  ;;  %v769_v14 = vsel %vm768_vm13, %v752_v36, 0.0  ;;  %v756_v18 = vsel %vm708_vm3, %v740_v20, 0.0 }
 0x17a   : > { %v771_v35 = vadd.f32 %v770_v60, %v769_v14  ;;  %v739_v57 = vmul.f32 %v1567_v56, %v656_v41  ;;  %v486_v33 = vmul.f32 0.6931472, %v1069_v0  ;;  %v776_v28 = vsel %vm768_vm13, %v756_v18, 0.0 }
 0x17b   : > { %v625_v63 = vpop.xlane.xlu1 %624  ;;  %v468_v24 = vpop.xlane.xlu0 %467 }
 0x17c   : > { %v755_v38 = vsel %vm707_vm5, %v739_v57, 0.0  ;;  %v658_v27 = vsub.f32 %v486_v33, %v622_v11  ;;  %v773_v62 = vadd.f32 %v772_v58, %v771_v35  ;;  %v659_v45 = vsub.f32 %v488_v47, %v625_v63 }
 0x17d   : > { %v1071_v2 = vpop.eup %1070  ;;  %v774_v43 = vsel %vm768_vm13, %v755_v38, 0.0  ;;  %1080 = vlog2.f32 %v468_v24 }
 0x17e   : > { %v741_v56 = vmul.f32 %v1594_v6, %v658_v27  ;;  %v775_v8 = vadd.f32 %v774_v43, %v773_v62  ;;  %1082 = vlog2.f32 %v465_v46  ;;  %v490_v25 = vmul.f32 0.6931472, %v1071_v2 }
 0x17f   : > { %v742_v32 = vmul.f32 %v1603_v48, %v659_v45  ;;  %v628_v54 = vpop.xlane.xlu1 %627  ;;  %v471_v12 = vpop.xlane.xlu0 %470 }
 0x180   : > { %v757_v49 = vsel %vm709_vm7, %v741_v56, 0.0  ;;  %v777_v50 = vadd.f32 %v776_v28, %v775_v8  ;;  %v660_v23 = vsub.f32 %v490_v25, %v628_v54  ;;  %1084 = vlog2.f32 %v471_v12 }
 0x181   : > { %v1073_v22 = vpop.eup %1072  ;;  %v778_v26 = vsel %vm768_vm13, %v757_v49, 0.0  ;;  %v758_v48 = vsel %vm710_vm9, %v742_v32, 0.0 }
 0x182   : > { %v1075_v29 = vpop.eup %1074  ;;  %v743_v6 = vmul.f32 %v1617_v42, %v660_v23  ;;  %v494_v30 = vmul.f32 0.6931472, %v1073_v22  ;;  %v779_v4 = vadd.f32 %v778_v26, %v777_v50  ;;  %v780_v11 = vsel %vm768_vm13, %v758_v48, 0.0 }
 0x183   : > { %v1077_v19 = vpop.eup %1076  ;;  %v634_v40 = vpop.xlane.xlu1 %633  ;;  %v492_v10 = vmul.f32 0.6931472, %v1075_v29 }
 0x184   : > { %v474_v39 = vpop.xlane.xlu0 %473  ;;  %v662_v44 = vsub.f32 %v494_v30, %v634_v40  ;;  %v759_v34 = vsel %vm711_vm11, %v743_v6, 0.0  ;;  %v1079_v20 = vpop.eup %1078  ;;  %v498_v46 = vmul.f32 0.6931472, %v1077_v19  ;;  %v781_v42 = vadd.f32 %v780_v11, %v779_v4 }
 0x185   : > { %1086 = vlog2.f32 %v474_v39  ;;  %v782_v0 = vsel %vm768_vm13, %v759_v34, 0.0  ;;  %v496_v33 = vmul.f32 0.6931472, %v1079_v20 }
 0x186   : > { %v745_v3 = vmul.f32 %v1644_v37, %v662_v44  ;;  %v783_v47 = vadd.f32 %v782_v0, %v781_v42 }
 0x187   : > { %v640_v36 = vpop.xlane.xlu1 %639 }
 0x188   : > { %v631_v41 = vpop.xlane.xlu0 %630  ;;  %v664_v60 = vsub.f32 %v498_v46, %v640_v36  ;;  %v761_v24 = vsel %vm713_vm1, %v745_v3, 0.0 }
 0x189   : > { %v661_v14 = vsub.f32 %v492_v10, %v631_v41  ;;  %v786_v8 = vsel %vm768_vm13, %v761_v24, 0.0 }
 0x18a   : > { %v1081_v35 = vpop.eup %1080  ;;  %v747_v38 = vmul.f32 %v1669_v15, %v664_v60 }
 0x18b   : > { %v744_v57 = vmul.f32 %v1636_v59, %v661_v14  ;;  %v1083_v52 = vpop.eup %1082  ;;  %v646_v58 = vpop.xlane.xlu1 %645  ;;  %v502_v18 = vmul.f32 0.6931472, %v1081_v35 }
 0x18c   : > { %v637_v63 = vpop.xlane.xlu0 %636  ;;  %v500_v43 = vmul.f32 0.6931472, %v1083_v52  ;;  %v763_v15 = vsel %vm715_vm0, %v747_v38, 0.0 }
 0x18d   : > { %v760_v27 = vsel %vm712_vm12, %v744_v57, 0.0  ;;  %v663_v37 = vsub.f32 %v496_v33, %v637_v63  ;;  %v666_v45 = vsub.f32 %v502_v18, %v646_v58  ;;  %v1085_v56 = vpop.eup %1084  ;;  %v790_v22 = vsel %vm768_vm13, %v763_v15, 0.0 }
 0x18e   : > { %v784_v62 = vsel %vm768_vm13, %v760_v27, 0.0  ;;  %v504_v23 = vmul.f32 0.6931472, %v1085_v56 }
 0x18f   : > { %v785_v2 = vadd.f32 %v784_v62, %v783_v47  ;;  %v746_v59 = vmul.f32 %v1661_v61, %v663_v37  ;;  %v749_v25 = vmul.f32 %v1693_v7, %v666_v45  ;;  %v652_v53 = vpop.xlane.xlu1 %651 }
 0x190   : > { %v643_v31 = vpop.xlane.xlu0 %642 }
 0x191   : > { %v787_v28 = vadd.f32 %v786_v8, %v785_v2  ;;  %v762_v51 = vsel %vm714_vm2, %v746_v59, 0.0  ;;  %v665_v32 = vsub.f32 %v500_v43, %v643_v31  ;;  %v765_v7 = vsel %vm717_vm6, %v749_v25, 0.0 }
 0x192   : > { %v1087_v54 = vpop.eup %1086  ;;  %v788_v12 = vsel %vm768_vm13, %v762_v51, 0.0  ;;  %v794_v40 = vsel %vm768_vm13, %v765_v7, 0.0 }
 0x193   : > { %v789_v49 = vadd.f32 %v788_v12, %v787_v28  ;;  %v506_v61 = vmul.f32 0.6931472, %v1087_v54  ;;  %v748_v50 = vmul.f32 %v1685_v1, %v665_v32 }
 0x194   : > { %v649_v26 = vpop.xlane.xlu0 %648 }
 0x195   : > { %v668_v29 = vsub.f32 %v506_v61, %v652_v53  ;;  %v791_v6 = vadd.f32 %v790_v22, %v789_v49  ;;  %v764_v55 = vsel %vm1837_vm10, %v748_v50, 0.0  ;;  %v667_v30 = vsub.f32 %v504_v23, %v649_v26 }
 0x196   : > { %v792_v19 = vsel %vm768_vm13, %v764_v55, 0.0 }
 0x197   : > { %v751_v4 = vmul.f32 %v1705_v13, %v668_v29  ;;  %v793_v48 = vadd.f32 %v792_v19, %v791_v6  ;;  %v750_v1 = vmul.f32 %v1709_v17, %v667_v30  ;;  %v858_v13 = vpop.xlane.xlu1 %857 }
 0x198   : > { %v859_v46 = vrot.slane %v858_v13, 4 }
 0x199   : > { %v766_v5 = vsel %vm718_vm8, %v750_v1, 0.0  ;;  %v767_v39 = vsel %vm719_vm4, %v751_v4, 0.0  ;;  %v795_v44 = vadd.f32 %v794_v40, %v793_v48 }
 0x19a   : > { %v796_v16 = vsel %vm768_vm13, %v766_v5, 0.0  ;;  %v798_v20 = vsel %vm768_vm13, %v767_v39, 0.0  ;;  %v860_v17 = vadd.f32 %v859_v46, %v858_v13 }
 0x19b   : > { %v797_v34 = vadd.f32 %v796_v16, %v795_v44 }
 0x19c   : > { %v861_v10 = vrot.slane %v860_v17, 2 }
 0x19d   : > { %v799_v11 = vadd.f32 %v798_v20, %v797_v34 }
 0x19e   : > { %v862_v41 = vadd.f32 %v861_v10, %v860_v17 }
 0x19f   : > { %800 = vadd.xlane.f32.xlu0 %v799_v11 }
 0x1a0   : > { %v863_v3 = vrot.slane %v862_v41, 1 }
 0x1a2   : > { %v864_v35 = vadd.f32 %v863_v3, %v862_v41 }
 0x228   : > { %v801_v42 = vpop.xlane.xlu0 %800 }
 0x229   : > { %v802_v36 = vrot.slane %v801_v42, 4 }
 0x22b   : > { %v803_v9 = vadd.f32 %v802_v36, %v801_v42 }
 0x22d   : > { %v804_v0 = vrot.slane %v803_v9, 2 }
 0x22f   : > { %v805_v21 = vadd.f32 %v804_v0, %v803_v9 }
 0x231   : > { %v806_v60 = vrot.slane %v805_v21, 1 }
 0x233   : > { %v807_v14 = vadd.f32 %v806_v60, %v805_v21 }
 0x235   : > { %978 = vpush %v807_v14 }
 0x236   : > { %980 = vpush %v864_v35 }
 0x266   : > { %s979_s9 = spop %978 }
 0x267   : > { %v809_v57 = vstv %s979_s9  ;;  %s981_s10 = spop %980 }
 0x268   : > { %v866_v33 = vstv %s981_s10 }
 0x269   : > { %v867_v52 = vsel %vm768_vm13, %v809_v57, %v866_v33 }
 0x26a   : > { %869 = vst.msk [vmem:[%s249_s7] sm:$0x1] %vm868_vm14, %v867_v52 }
 0x26b   : > { %1101 = shalt.err (!%p1098_p3)
}
 0x26c   : > { %s1102_s30 = scalar_lea.hbm %s1792_s13, 16  ;;  %s1106_s26 = scalar_lea.hbm %s1833_s5, 32 }
 0x26d   : > { %p1103_p4 = scmp.ne.s32.totalorder %s1792_s13, %s1102_s30  ;;  %p1107_p9 = scmp.lt.s32.totalorder %s1792_s13, %s1833_s5 }
 0x26e   : > { %p1108_p10 = scmp.lt.s32.totalorder %s1106_s26, %s1102_s30 }
 0x26f   : > { %p1104_p7 = pnand %p1103_p4, %p1220_p5 }
 0x270   : > { %p1109_p11 = por %p1108_p10, %p1107_p9 }
 0x271   : > { %p1105_p8 = pneg %p1104_p7 }
 0x273   : > { %p1110_p12 = pnand %p1109_p11, %p1105_p8 }
 0x275   : > { %1113 = shalt.err (!%p1110_p12)
}
 0x276   : > { %982 = dma.vmem_to_hbm [thread:$0]  (%p1220_p5), %s884_s8, 16, %s1792_s13, %s871_s14  }
 0x277 PF: > { %p988_p13 = scmp.ge.s32.totalorder %s1148_s21, 2  ;;  %s895_s9 = sand.u32 1, %s1136_s18  }
 0x278   : > { %s896_s10 = scalar_lea.sflag [#allocation3], %s895_s9 }
 0x279   : > { %p985_p0 = pnand %p988_p13, %p1224_p6 }
 0x27b   : > { %p986_p1 = pneg %p985_p0 }
 0x27d   : > { %1131 = dma.done.wait (%p986_p1), %s896_s10, 16  }
 0x27e   : > { %1133 = vsyncadd (%p986_p1), %s896_s10, 4294967280  ;;  %p15_p2 = scmp.ge.s32.totalorder %s1207_s24, 4   ;;  %s1838_s18 = smov %s1140_s19 }
 0x27f   : > { %s1839_s19 = smov %s1144_s20  ;;  %s1840_s20 = smov %s1218_s27 }
 0x280   : > { %s1841_s21 = smov %s1207_s24  ;;  %17 = sbr.rel (!%p15_p2) target bundleno = 3 (0x3), region = 81 }
 0x285   :  { %900 = vsyncpa [#allocation3], 1 }
 0x286   :  { %902 = vsyncpa [#allocation3 + $0x1], 1 }

</bundles_post_ra>
